<compile_context>
chip_gen: v6e
topology: v6e:2x2x1
jax: 0.10.0
libtpu: 0.0.40
codegen_flags: <defaults>
</compile_context>

<pallas_src>
import functools

import jax
import jax.numpy as jnp
from jax import lax
from jax.experimental import pallas as pl
from jax.experimental.pallas import tpu as pltpu


# -----------------------------------------------------------------------------
# VMEM budget (chip-aware, safe fallback).
# -----------------------------------------------------------------------------
try:
    _VMEM_CAP = int(pltpu.get_tpu_info().vmem_capacity_bytes)
except Exception:  # query unavailable -> assume the smallest (v7x: 64 MiB)
    _VMEM_CAP = 64 << 20
_VMEM_LIMIT = min(64 << 20, max(32 << 20, (_VMEM_CAP * 3) // 4))


# -----------------------------------------------------------------------------
# Pallas kernel: fused channel-LayerNorm (WithBias) + project_in 1x1 conv.
# PyTorch semantics per pixel (LayerNorm = to_4d(WithBias_LayerNorm(to_3d(x)))):
#   mu = mean_C(x); sigma = var_C(x, unbiased=False)
#   n  = (x - mu) / sqrt(sigma + 1e-5) * weight + bias
#   out = project_in_weight @ n            (1x1 conv, bias=False)
# -----------------------------------------------------------------------------
def _ln_project_in_kernel(x_ref, wb_ref, pw_ref, o_ref, *, inv_c: float):
    # x_ref: (C, TS) lane-dense spatial slab; wb_ref: (C, 2) f32 with
    # [:, 0]=weight, [:, 1]=bias; pw_ref: (Cout, C) f32; o_ref: (Cout, TS).
    x = x_ref[...].astype(jnp.float32)
    mean = jnp.sum(x, axis=0, keepdims=True) * inv_c          # (1, TS) sublane reduce
    xc = x - mean
    var = jnp.sum(xc * xc, axis=0, keepdims=True) * inv_c     # two-pass, unbiased=False
    inv = lax.rsqrt(var + 1e-5)
    y = xc * inv * wb_ref[:, 0:1] + wb_ref[:, 1:2]            # (C, TS) normalized
    # project_in 1x1 conv == channel matmul; MXU is otherwise idle here, so the
    # dot is ~free and we avoid writing/re-reading the LN output through HBM.
    o_ref[...] = jnp.dot(pw_ref[...], y,
                         preferred_element_type=jnp.float32).astype(o_ref.dtype)


def _pick_spatial_tile(hw, bytes_per_lane, batch, *, target_bytes=4 << 20,
                       min_steps=4, min_lanes=512):
    """Pick a lane-dense spatial tile (multiple of 128) and the padded extent.

    Prefers tiles that divide the 128-rounded extent exactly (zero padding
    traffic); otherwise pads up to a multiple of the byte-budget tile.  Keeps
    >= min_steps grid steps (pipelining; both v7x TensorCores) without letting
    the lane width fall below ~min_lanes.
    """
    hw128 = ((hw + 127) // 128) * 128
    cap = max(128, (target_bytes // max(bytes_per_lane, 1)) // 128 * 128)
    tile = min(cap, hw128)
    q = hw128 // 128
    for d in range(tile // 128, 0, -1):       # largest 128-multiple divisor <= tile
        if q % d == 0:
            if 2 * 128 * d >= tile:           # accept if within 2x of the budget tile
                tile = 128 * d
            break
    while batch * (-(-hw128 // tile)) < min_steps and tile > min_lanes:
        tile = max(128, (tile // 2) // 128 * 128)
    hw_pad = (-(-hw128 // tile)) * tile
    return tile, hw_pad


@jax.jit
def layernorm_project_in(x, weight, bias, pin_w):
    """Fused to_4d(WithBias_LayerNorm(to_3d(x))) + project_in 1x1 conv (NCHW)."""
    B, C, H, W = x.shape
    Cout = pin_w.shape[0]
    HW = H * W
    itemsize = jnp.dtype(x.dtype).itemsize
    # Per-lane VMEM footprint: double-buffered input + output blocks plus the
    # in-kernel f32 temporaries (x/xc/y and the matmul accumulator).
    bytes_per_lane = (2 * C * itemsize + 2 * Cout * itemsize
                      + 3 * C * 4 + Cout * 4)
    tile, hw_pad = _pick_spatial_tile(HW, bytes_per_lane, B)

    x3 = x.reshape(B, C, HW)                                   # free view, no transpose
    if hw_pad != HW:
        # Per-pixel op: padded columns produce finite junk and are sliced off.
        x3 = jnp.pad(x3, ((0, 0), (0, 0), (0, hw_pad - HW)))
    wb = jnp.stack([weight, bias], axis=1).astype(jnp.float32)  # (C, 2), hoisted cast
    pw = pin_w.reshape(Cout, C).astype(jnp.float32)             # (Cout, C)

    grid = (B, hw_pad // tile)
    kernel = functools.partial(_ln_project_in_kernel, inv_c=1.0 / C)
    # TODO(synk): pipeline_mode=pl.Buffered(3) on the x input is a possible
    # small v7x win (DMA-latency smoothing); left at the default depth here.
    out = pl.pallas_call(
        kernel,
        out_shape=jax.ShapeDtypeStruct((B, Cout, hw_pad), x.dtype),
        grid_spec=pltpu.PrefetchScalarGridSpec(
            num_scalar_prefetch=0,
            grid=grid,
            in_specs=[
                pl.BlockSpec((None, C, tile), lambda bi, si: (bi, 0, si)),
                pl.BlockSpec((C, 2), lambda bi, si: (0, 0)),
                pl.BlockSpec((Cout, C), lambda bi, si: (0, 0)),
            ],
            out_specs=pl.BlockSpec((None, Cout, tile), lambda bi, si: (bi, 0, si)),
        ),
        compiler_params=pltpu.CompilerParams(
            dimension_semantics=("parallel", "parallel"),
            vmem_limit_bytes=_VMEM_LIMIT,
        ),
    )(x3, wb, pw)
    return out[:, :, :HW].reshape(B, Cout, H, W)


# -----------------------------------------------------------------------------
# Plain-JAX glue for the rest of down_v2 (convs / GELU / pooling).
# TODO(synk): the strided 3x3 conv, depthwise 3x3 conv, erf-GELU gate, sca
# pooling and project_out run via XLA (lax.conv / jax.nn); they are not the
# custom op of this module. (Fusing the depthwise/gate into the Pallas kernel
# is a possible follow-up.)
# -----------------------------------------------------------------------------
def _conv2d(x, w, b=None, *, stride=1, padding=0, groups=1):
    dn = lax.conv_dimension_numbers(x.shape, w.shape, ("NCHW", "OIHW", "NCHW"))
    y = lax.conv_general_dilated(
        x, w, window_strides=(stride, stride),
        padding=[(padding, padding), (padding, padding)],
        dimension_numbers=dn, feature_group_count=groups)
    if b is not None:
        y = y + b.reshape(1, -1, 1, 1)
    return y


def _layernorm_ref(x, weight, bias):
    """Pure-JAX reference with the exact PyTorch layout (to_3d -> LN -> to_4d)."""
    xl = jnp.transpose(x, (0, 2, 3, 1)).astype(jnp.float32)     # b h w c
    mu = jnp.mean(xl, axis=-1, keepdims=True)
    var = jnp.var(xl, axis=-1, keepdims=True)                   # unbiased=False
    y = (xl - mu) / jnp.sqrt(var + 1e-5) * weight.astype(jnp.float32) \
        + bias.astype(jnp.float32)
    return jnp.transpose(y, (0, 3, 1, 2)).astype(x.dtype)


def _feedforward_tail(t, p):
    """FeedForward after project_in: dwconv -> gelu-gate -> sca -> project_out."""
    t = _conv2d(t, p["dw_w"], padding=1, groups=p["dw_w"].shape[0])  # depthwise 3x3
    h = p["dw_w"].shape[0] // 2
    x1, x2 = t[:, :h], t[:, h:]
    g = jax.nn.gelu(x1, approximate=False) * x2                      # F.gelu (erf) gate
    s = jnp.mean(g, axis=(2, 3), keepdims=True)                      # AdaptiveAvgPool2d(1)
    s = _conv2d(s, p["sca_w"], p["sca_b"])                           # sca 1x1 (bias=True)
    g = g * s
    return _conv2d(g, p["pout_w"])                                   # project_out 1x1


@functools.partial(jax.jit, static_argnames=("use_pallas",))
def down_v2_forward(x, p, *, use_pallas=True):
    y = _conv2d(x, p["d_w"], p["d_b"], stride=2, padding=1)          # self.d
    if use_pallas:
        # Fused LayerNorm + project_in (Pallas).
        t = layernorm_project_in(y, p["ln_w"], p["ln_b"], p["pin_w"])
    else:
        n = _layernorm_ref(y, p["ln_w"], p["ln_b"])
        t = _conv2d(n, p["pin_w"])
    return y + _feedforward_tail(t, p)                               # x + m(n(x))


if __name__ == "__main__":
    key = jax.random.PRNGKey(0)
    B, in_nc, out_nc, H, W = 2, 4, 8, 16, 16
    h_dim = int(out_nc * 2.66)             # 21, as in FeedForward(dim, 2.66, False)
    ks = jax.random.split(key, 10)

    def init(k, shape, scale=0.1):
        return scale * jax.random.normal(k, shape, jnp.float32)

    x = jax.random.normal(ks[0], (B, in_nc, H, W), jnp.float32)
    p = {
        "d_w": init(ks[1], (out_nc, in_nc, 3, 3)),
        "d_b": init(ks[2], (out_nc,)),
        # PyTorch init is ones/zeros; perturb slightly to exercise the affine terms.
        "ln_w": jnp.ones((out_nc,), jnp.float32) + init(ks[3], (out_nc,), 0.05),
        "ln_b": init(ks[4], (out_nc,), 0.05),
        "pin_w": init(ks[5], (2 * h_dim, out_nc, 1, 1)),
        "dw_w": init(ks[6], (2 * h_dim, 1, 3, 3)),
        "sca_w": init(ks[7], (h_dim, h_dim, 1, 1)),
        "sca_b": init(ks[8], (h_dim,)),
        "pout_w": init(ks[9], (out_nc, h_dim, 1, 1)),
    }

    out = jax.block_until_ready(down_v2_forward(x, p, use_pallas=True))

    # Check the fused Pallas (LayerNorm + project_in) against the reference path.
    y = _conv2d(x, p["d_w"], p["d_b"], stride=2, padding=1)
    t_pallas = jax.block_until_ready(
        layernorm_project_in(y, p["ln_w"], p["ln_b"], p["pin_w"]))
    t_ref = _conv2d(_layernorm_ref(y, p["ln_w"], p["ln_b"]), p["pin_w"])
    assert t_pallas.shape == t_ref.shape
    assert jnp.allclose(t_pallas, t_ref, atol=2e-3, rtol=2e-3), "LN+project_in mismatch"

    # Check the full down_v2 forward against the all-JAX reference path.
    ref = down_v2_forward(x, p, use_pallas=False)
    assert out.shape == (B, out_nc, H // 2, W // 2)
    assert jnp.allclose(out, ref, atol=5e-3, rtol=5e-3), "down_v2 mismatch"

    print("KERNEL_OK")
</pallas_src>

<mosaic_0001>
module attributes {stable_mosaic.version = 11 : i64} {
  func.func @_ln_project_in_kernel(%arg0: i32, %arg1: i32, %arg2: memref<1x8x128xf32, #tpu.memory_space<vmem>>, %arg3: memref<8x2xf32, #tpu.memory_space<vmem>>, %arg4: memref<42x8xf32, #tpu.memory_space<vmem>>, %arg5: memref<1x42x128xf32, #tpu.memory_space<vmem>>) attributes {dimension_semantics = [#tpu.dimension_semantics<parallel>, #tpu.dimension_semantics<parallel>], iteration_bounds = array<i64: 2, 1>, scalar_prefetch = 0 : i64, scratch_operands = 0 : i64, tpu.core_type = #tpu.core_type<tc>, window_params = [{transform_indices = @transform_0, window_bounds = array<i64: 1, 8, 128>}, {pipeline_mode = #tpu.pipeline_mode<synchronous>, transform_indices = @transform_1, window_bounds = array<i64: 8, 2>}, {pipeline_mode = #tpu.pipeline_mode<synchronous>, transform_indices = @transform_2, window_bounds = array<i64: 42, 8>}, {transform_indices = @transform_3, window_bounds = array<i64: 1, 42, 128>}]} {
    %c0 = arith.constant 0 : index
    %c0_0 = arith.constant 0 : index
    %c0_1 = arith.constant 0 : index
    %0 = vector.load %arg2[%c0, %c0_0, %c0_1] : memref<1x8x128xf32, #tpu.memory_space<vmem>>, vector<1x8x128xf32>
    %1 = vector.shape_cast %0 : vector<1x8x128xf32> to vector<8x128xf32>
    %cst = arith.constant dense<0.000000e+00> : vector<128xf32>
    %2 = vector.multi_reduction <add>, %1, %cst [0] : vector<8x128xf32> to vector<128xf32>
    %3 = vector.shape_cast %2 : vector<128xf32> to vector<1x128xf32>
    %cst_2 = arith.constant 1.250000e-01 : f32
    %4 = vector.broadcast %cst_2 : f32 to vector<1x128xf32>
    %5 = arith.mulf %3, %4 : vector<1x128xf32>
    %6 = vector.broadcast %5 : vector<1x128xf32> to vector<8x128xf32>
    %7 = arith.subf %1, %6 : vector<8x128xf32>
    %8 = arith.mulf %7, %7 : vector<8x128xf32>
    %cst_3 = arith.constant dense<0.000000e+00> : vector<128xf32>
    %9 = vector.multi_reduction <add>, %8, %cst_3 [0] : vector<8x128xf32> to vector<128xf32>
    %10 = vector.shape_cast %9 : vector<128xf32> to vector<1x128xf32>
    %cst_4 = arith.constant 1.250000e-01 : f32
    %11 = vector.broadcast %cst_4 : f32 to vector<1x128xf32>
    %12 = arith.mulf %10, %11 : vector<1x128xf32>
    %cst_5 = arith.constant 9.99999974E-6 : f32
    %13 = vector.broadcast %cst_5 : f32 to vector<1x128xf32>
    %14 = arith.addf %12, %13 : vector<1x128xf32>
    %15 = math.rsqrt %14 : vector<1x128xf32>
    %16 = vector.broadcast %15 : vector<1x128xf32> to vector<8x128xf32>
    %17 = arith.mulf %7, %16 : vector<8x128xf32>
    %c0_6 = arith.constant 0 : index
    %c0_7 = arith.constant 0 : index
    %18 = vector.load %arg3[%c0_6, %c0_7] : memref<8x2xf32, #tpu.memory_space<vmem>>, vector<8x1xf32>
    %19 = vector.broadcast %18 : vector<8x1xf32> to vector<8x128xf32>
    %20 = arith.mulf %17, %19 : vector<8x128xf32>
    %c0_8 = arith.constant 0 : index
    %c1 = arith.constant 1 : index
    %21 = vector.load %arg3[%c0_8, %c1] : memref<8x2xf32, #tpu.memory_space<vmem>>, vector<8x1xf32>
    %22 = vector.broadcast %21 : vector<8x1xf32> to vector<8x128xf32>
    %23 = arith.addf %20, %22 : vector<8x128xf32>
    %c0_9 = arith.constant 0 : index
    %c0_10 = arith.constant 0 : index
    %24 = vector.load %arg4[%c0_9, %c0_10] : memref<42x8xf32, #tpu.memory_space<vmem>>, vector<42x8xf32>
    %cst_11 = arith.constant dense<0.000000e+00> : vector<42x128xf32>
    %25 = tpu.matmul %24, %23, %cst_11 {dimension_numbers = #tpu.dot_dimension_numbers<[1], [0], [0], [1], [0, 0, 1, 1], [], []>} : vector<42x8xf32>, vector<8x128xf32>, vector<42x128xf32> -> vector<42x128xf32>
    %c0_12 = arith.constant 0 : index
    %c0_13 = arith.constant 0 : index
    %c0_14 = arith.constant 0 : index
    %26 = vector.load %arg5[%c0_12, %c0_13, %c0_14] : memref<1x42x128xf32, #tpu.memory_space<vmem>>, vector<1x42x128xf32>
    %27 = vector.shape_cast %26 : vector<1x42x128xf32> to vector<42x128xf32>
    %28 = vector.shape_cast %25 : vector<42x128xf32> to vector<1x42x128xf32>
    tpu.vector_store %arg5[%c0_12, %c0_13, %c0_14], %28 {strides = array<i32>} : memref<1x42x128xf32, #tpu.memory_space<vmem>>, vector<1x42x128xf32>,
    return
  }
  func.func @transform_0(%arg0: i32, %arg1: i32) -> (i32, i32, i32) {
    %c0_i32 = arith.constant 0 : i32
    %c0_i32_0 = arith.constant 0 : i32
    return %arg0, %c0_i32, %arg1 : i32, i32, i32
  }
  func.func @transform_1(%arg0: i32, %arg1: i32) -> (i32, i32) {
    %c0_i32 = arith.constant 0 : i32
    %c0_i32_0 = arith.constant 0 : i32
    %c0_i32_1 = arith.constant 0 : i32
    return %c0_i32, %c0_i32_0 : i32, i32
  }
  func.func @transform_2(%arg0: i32, %arg1: i32) -> (i32, i32) {
    %c0_i32 = arith.constant 0 : i32
    %c0_i32_0 = arith.constant 0 : i32
    %c0_i32_1 = arith.constant 0 : i32
    return %c0_i32, %c0_i32_0 : i32, i32
  }
  func.func @transform_3(%arg0: i32, %arg1: i32) -> (i32, i32, i32) {
    %c0_i32 = arith.constant 0 : i32
    %c0_i32_0 = arith.constant 0 : i32
    return %arg0, %c0_i32, %arg1 : i32, i32, i32
  }
}

</mosaic_0001>

<bundles_post_ra>
// kernel: layernorm_project_in.1
= control target key start
LH: loop header
LB: loop body
LE: loop exit
PB: predicated region body
PF: predicated region fallthrough
CT: control target
= control target key end

     0   :  { %s549_s12 = smov 0   ;;  %s551_s13 = smov 0   ;;  %s613_s0 = inlined_call_operand.vmem [shape: f32[2,8,128], index: 0, kind: input, shape index: {}]   ;;  %s614_s1 = inlined_call_operand.vmem [shape: f32[8,2], index: 1, kind: input, shape index: {}]   ;;  %s615_s2 = inlined_call_operand.vmem [shape: f32[42,8], index: 2, kind: input, shape index: {}]   ;;  %s616_s3 = inlined_call_operand.vmem [shape: f32[2,42,128], index: 3, kind: output, shape index: {}]  }
   0x1   :  { %s553_s14 = smov 0  }
   0x2 LB: > { %s25_s15 = sadd.s32 1, %s521_s13  ;;  %p441_p0 = scmp.ge.s32.totalorder %s525_s14, 1  ;;  %s525_s14 = sphi %s553_s14, %s13_s14   ;;  %s521_s13 = sphi %s551_s13, %s618_s13   ;;  %s517_s12 = sphi %s549_s12, %s617_s12  }
   0x3   : > { %p27_p1 = scmp.ge.s32.totalorder %s25_s15, 2  ;;  %p155_p2 = scmp.lt.s32.totalorder %s525_s14, 3 }
   0x5   : > { %s620_s15 = smov (%p27_p1, %s25_s15), 0  ;;  %p156_p3 = pnand %p441_p0, %p155_p2 }
   0x6   : > { %p184_p4 = scmp.lt.s32.totalorder (!%p156_p3), %s517_s12, 1 }
   0x7   : > { %159 = sbr.rel (%p156_p3) target bundleno = 347 (0x15b), region = 32 }
   0xc   : > { %v219_v0 = vld [vmem:[%s614_s1] sm:$0xff]  ;;  %v527_v1 = vmov 0   ;;  %v233_v2 = vld [vmem:[%s615_s2 + $0x10] sm:$0xff]  ;;  %vm237_vm0 = vcmask 64512   ;;  %v528_v3 = vmov 1   ;;  %s622_s12 = smov (!%p184_p4, %s517_s12), 1 }
   0xd   : > { %499 = vset.pattern.permute.xlu0 %v527_v1  ;;  %464 = vmatprep.mubr.msk.f32.mxu1 %vm237_vm0, %v233_v2  ;;  %v231_v4 = vld [vmem:[%s615_s2] sm:$0xff]  ;;  %s442_s22 = sshll.u32 %s622_s12, 3  ;;  %v234_v29 = vld [vmem:[%s615_s2 + $0x18] sm:$0xff]  ;;  %v232_v30 = vld [vmem:[%s615_s2 + $0x8] sm:$0xff]  ;;  %s472_s7 = smul.u32 48, %s622_s12 }
   0xe   : > { %222 = vperm.xlu0 %499, %v219_v0   ;;  %461 = vmatprep.mubr.msk.f32.mxu0 %vm237_vm0, %v231_v4  ;;  %s190_s25 = scalar_lea.vmem %s613_s0, %s442_s22  ;;  %v235_v31 = vld [vmem:[%s615_s2 + $0x20] sm:$0xff]  ;;  %v236_v32 = vld [vmem:[%s615_s2 + $0x28] sm:$0x3] }
   0xf   : > { %v199_v5 = vld [vmem:[%s190_s25] sm:$0xff]  ;;  %s198_s10 = scalar_lea.vmem %s616_s3, %s472_s7 }
  0x10   : > { %v200_v6 = vrot.slane %v199_v5, 4 }
  0x12   : > { %500 = vset.pattern.permute.xlu0 %v528_v3  ;;  %v201_v7 = vadd.f32 %v200_v6, %v199_v5 }
  0x13   : > { %227 = vperm.xlu0 %500, %v219_v0  }
  0x14   : > { %v202_v8 = vrot.slane %v201_v7, 2 }
  0x16   : > { %v203_v9 = vadd.f32 %v202_v8, %v201_v7 }
  0x18   : > { %v204_v10 = vrot.slane %v203_v9, 1 }
  0x1a   : > { %v205_v11 = vadd.f32 %v204_v10, %v203_v9 }
  0x1c   : > { %v206_v12 = vmul.f32 0.125, %v205_v11 }
  0x1e   : > { %v207_v13 = vsub.f32 %v199_v5, %v206_v12 }
  0x20   : > { %v208_v14 = vmul.f32 %v207_v13, %v207_v13 }
  0x22   : > { %v209_v15 = vrot.slane %v208_v14, 4 }
  0x24   : > { %v210_v16 = vadd.f32 %v209_v15, %v208_v14 }
  0x26   : > { %v211_v17 = vrot.slane %v210_v16, 2 }
  0x28   : > { %v212_v18 = vadd.f32 %v211_v17, %v210_v16 }
  0x2a   : > { %v213_v19 = vrot.slane %v212_v18, 1 }
  0x2c   : > { %v214_v20 = vadd.f32 %v213_v19, %v212_v18 }
  0x2e   : > { %v215_v21 = vmul.f32 0.125, %v214_v20 }
  0x30   : > { %v216_v22 = vadd.f32 1e-05, %v215_v21 }
  0x32   : > { %501 = vrsqrt.f32 %v216_v22 }
  0x3f   : > { %v502_v23 = vpop.eup %501 }
  0x40   : > { %v218_v25 = vmul.f32 %v502_v23, %v207_v13 }
  0x89   : > { %v223_v24 = vpop.permute.xlu0 %222 }
  0x8a   : > { %v225_v26 = vmul.f32 %v223_v24, %v218_v25 }
  0x8e   : > { %v228_v27 = vpop.permute.xlu0 %227 }
  0x8f   : > { %v230_v28 = vadd.f32 %v228_v27, %v225_v26 }
  0x91   : > { %459 = vmatprep.subr.mxu0 %v230_v28  ;;  %470 = vmatprep.subr.mxu1 %v230_v28 }
  0x92   : > { %460 = vmatpush3.msra.mxu0 %v230_v28  ;;  %471 = vmatpush3.msra.mxu1 %v230_v28 }
  0x93   : > { %465 = vmatmul.mubr.msk.f32.vlgmr.msra.gmra.mxu1 %vm237_vm0, %v234_v29  ;;  %462 = vmatmul.mubr.msk.f32.vlgmr.msra.gmra.mxu0 %vm237_vm0, %v232_v30 }
  0x94   : > { %467 = vmatprep.mubr.msk.f32.mxu1 %vm237_vm0, %v235_v31 }
  0x97   : > { %468 = vmatmul.mubr.msk.f32.gmra.mxu1 %vm237_vm0, %v236_v32 }
 0x153   : > { %v466_v33 = vpop.f32.mrf.mxu1  ;;  %v463_v34 = vpop.f32.mrf.mxu0 }
 0x154   : > { %354 = vst [vmem:[%s198_s10 + $0x18] sm:$0xff] %v466_v33  ;;  %352 = vst [vmem:[%s198_s10 + $0x8] sm:$0xff] %v463_v34 }
 0x155   : > { %v332_v35 = vpop.f32.mrf.mxu1  ;;  %v322_v36 = vpop.f32.mrf.mxu0 }
 0x156   : > { %353 = vst [vmem:[%s198_s10 + $0x10] sm:$0xff] %v332_v35  ;;  %351 = vst [vmem:[%s198_s10] sm:$0xff] %v322_v36 }
 0x157   : > { %v469_v37 = vpop.f32.mrf.mxu1 }
 0x158   : > { %356 = vst [vmem:[%s198_s10 + $0x28] sm:$0x3] %v469_v37 }
 0x159   : > { %v342_v38 = vpop.f32.mrf.mxu1 }
 0x15a   : > { %355 = vst [vmem:[%s198_s10 + $0x20] sm:$0xff] %v342_v38 }
 0x15b PF: > { %s13_s14 = sadd.s32 1, %s525_s14   ;;  %s617_s12 = smov %s521_s13 }
 0x15c   : > { %p10_p5 = scmp.ge.s32.totalorder %s13_s14, 4   ;;  %s618_s13 = smov %s620_s15 }
 0x15e   :  { %12 = sbr.rel (!%p10_p5) target bundleno = 2 (0x2), region = 62 }

</bundles_post_ra>
